<compile_context>
chip_gen: v6e
topology: v6e:2x2x1
jax: 0.10.0
libtpu: 0.0.40
codegen_flags: <defaults>
</compile_context>

<pallas_src>
import functools

import jax
import jax.numpy as jnp
from jax.experimental import pallas as pl
from jax.experimental.pallas import tpu as pltpu

MARGIN = 0.5   # TripletLoss(margin=0.5)
EPS = 1e-6     # F.pairwise_distance default eps (added to the difference)


def _triplet_loss_kernel(apn_ref, o_ref, *, margin, inv_b):
    # apn_ref: (3, B, D) stacked [anchor, positive, negative], one VMEM slab.
    a = apn_ref[0]                       # (B, D) static views -> no extra DMA
    p = apn_ref[1]
    n = apn_ref[2]
    if a.dtype != jnp.float32:           # upcast in-kernel only when needed (bf16 inputs)
        a = a.astype(jnp.float32)
        p = p.astype(jnp.float32)
        n = n.astype(jnp.float32)

    # F.pairwise_distance semantics: ||x1 - x2 + eps||_2 along the last dim.
    dp = a - p + EPS
    dn = a - n + EPS
    pos = jnp.sqrt(jnp.sum(dp * dp, axis=-1, keepdims=True))   # (B, 1) XLU lane reduce
    neg = jnp.sqrt(jnp.sum(dn * dn, axis=-1, keepdims=True))   # (B, 1)

    hinge = jnp.maximum(pos - neg + margin, 0.0)                # (B, 1)
    # mean over batch: full reduce + compile-time 1/B multiply, scalar -> SMEM.
    o_ref[0, 0] = jnp.sum(hinge) * inv_b


def triplet_loss(apn, margin=MARGIN):
    """TripletLoss.forward on a stacked slab.

    apn: (3, B, D) array, apn[0]=anchor, apn[1]=positive, apn[2]=negative.
    Returns a scalar f32 loss.
    """
    assert apn.ndim == 3 and apn.shape[0] == 3, "expected stacked (3, B, D) input"
    _, b, d = apn.shape
    assert d % 128 == 0, "embedding dim must be lane-aligned (multiple of 128)"

    itemsize = jnp.dtype(apn.dtype).itemsize
    cost = pl.CostEstimate(
        flops=3 * 2 * b * d,              # two diffs+squares+adds, hinge, mean
        transcendentals=2 * b,            # two sqrts per row
        bytes_accessed=3 * b * d * itemsize + 4,
    )

    kernel = functools.partial(_triplet_loss_kernel,
                               margin=float(margin), inv_b=1.0 / b)
    out = pl.pallas_call(
        kernel,
        out_shape=jax.ShapeDtypeStruct((1, 1), jnp.float32),
        in_specs=[pl.BlockSpec((3, b, d), lambda: (0, 0, 0))],
        out_specs=pl.BlockSpec(memory_space=pltpu.MemorySpace.SMEM),
        cost_estimate=cost,
    )(apn)
    return out[0, 0]


# ----- pure-JAX reference (correctness check) -----
def triplet_loss_ref(a, p, n, margin=MARGIN, eps=EPS):
    pos = jnp.sqrt(jnp.sum((a - p + eps) ** 2, axis=-1))
    neg = jnp.sqrt(jnp.sum((a - n + eps) ** 2, axis=-1))
    return jnp.mean(jnp.maximum(pos - neg + margin, 0.0))


if __name__ == "__main__":
    B, D = 8, 128
    root = jax.random.PRNGKey(0)
    ka, kp, kn = jax.random.split(root, 3)

    anchor = jax.random.normal(ka, (B, D), jnp.float32)
    # positives close to the anchor, negatives slightly farther, so some rows
    # have positive hinge and others clamp to zero (exercises the relu).
    positive = anchor + 0.30 * jax.random.normal(kp, (B, D), jnp.float32)
    negative = anchor + 0.35 * jax.random.normal(kn, (B, D), jnp.float32)

    # Caller-side stacked slab (one-time data prep) -> single input DMA.
    apn = jnp.stack([anchor, positive, negative], axis=0)

    loss = jax.block_until_ready(triplet_loss(apn))
    ref = triplet_loss_ref(anchor, positive, negative)

    assert loss.shape == () and loss.dtype == jnp.float32
    assert jnp.allclose(loss, ref, rtol=1e-5, atol=1e-6), (float(loss), float(ref))
    print("KERNEL_OK")
</pallas_src>

<mosaic_0001>
module attributes {stable_mosaic.version = 11 : i64} {
  func.func @_triplet_loss_kernel(%arg0: memref<3x8x128xf32, #tpu.memory_space<vmem>>, %arg1: memref<1x1xf32, #tpu.memory_space<smem>>) attributes {dimension_semantics = [], scalar_prefetch = 0 : i64, scratch_operands = 0 : i64, tpu.core_type = #tpu.core_type<tc>} {
    %c0 = arith.constant 0 : index
    %c0_0 = arith.constant 0 : index
    %c0_1 = arith.constant 0 : index
    %0 = vector.load %arg0[%c0, %c0_0, %c0_1] : memref<3x8x128xf32, #tpu.memory_space<vmem>>, vector<1x8x128xf32>
    %1 = vector.shape_cast %0 : vector<1x8x128xf32> to vector<8x128xf32>
    %c1 = arith.constant 1 : index
    %c0_2 = arith.constant 0 : index
    %c0_3 = arith.constant 0 : index
    %2 = vector.load %arg0[%c1, %c0_2, %c0_3] : memref<3x8x128xf32, #tpu.memory_space<vmem>>, vector<1x8x128xf32>
    %3 = vector.shape_cast %2 : vector<1x8x128xf32> to vector<8x128xf32>
    %c2 = arith.constant 2 : index
    %c0_4 = arith.constant 0 : index
    %c0_5 = arith.constant 0 : index
    %4 = vector.load %arg0[%c2, %c0_4, %c0_5] : memref<3x8x128xf32, #tpu.memory_space<vmem>>, vector<1x8x128xf32>
    %5 = vector.shape_cast %4 : vector<1x8x128xf32> to vector<8x128xf32>
    %6 = arith.subf %1, %3 : vector<8x128xf32>
    %cst = arith.constant 9.99999997E-7 : f32
    %7 = vector.broadcast %cst : f32 to vector<8x128xf32>
    %8 = arith.addf %6, %7 : vector<8x128xf32>
    %9 = arith.subf %1, %5 : vector<8x128xf32>
    %cst_6 = arith.constant 9.99999997E-7 : f32
    %10 = vector.broadcast %cst_6 : f32 to vector<8x128xf32>
    %11 = arith.addf %9, %10 : vector<8x128xf32>
    %12 = arith.mulf %8, %8 : vector<8x128xf32>
    %cst_7 = arith.constant dense<0.000000e+00> : vector<8xf32>
    %13 = vector.multi_reduction <add>, %12, %cst_7 [1] : vector<8x128xf32> to vector<8xf32>
    %14 = vector.shape_cast %13 : vector<8xf32> to vector<8x1xf32>
    %15 = math.sqrt %14 : vector<8x1xf32>
    %16 = arith.mulf %11, %11 : vector<8x128xf32>
    %cst_8 = arith.constant dense<0.000000e+00> : vector<8xf32>
    %17 = vector.multi_reduction <add>, %16, %cst_8 [1] : vector<8x128xf32> to vector<8xf32>
    %18 = vector.shape_cast %17 : vector<8xf32> to vector<8x1xf32>
    %19 = math.sqrt %18 : vector<8x1xf32>
    %20 = arith.subf %15, %19 : vector<8x1xf32>
    %cst_9 = arith.constant 5.000000e-01 : f32
    %21 = vector.broadcast %cst_9 : f32 to vector<8x1xf32>
    %22 = arith.addf %20, %21 : vector<8x1xf32>
    %cst_10 = arith.constant 0.000000e+00 : f32
    %23 = vector.broadcast %cst_10 : f32 to vector<8x1xf32>
    %24 = arith.maximumf %22, %23 : vector<8x1xf32>
    %25 = vector.shape_cast %24 : vector<8x1xf32> to vector<1x8x1xf32>
    %cst_11 = arith.constant dense<0.000000e+00> : vector<1xf32>
    %26 = vector.multi_reduction <add>, %25, %cst_11 [1, 2] : vector<1x8x1xf32> to vector<1xf32>
    %27 = vector.shape_cast %26 : vector<1xf32> to vector<1x1x1xf32>
    %28 = vector.extract %27[0, 0, 0] : f32 from vector<1x1x1xf32>
    %cst_12 = arith.constant 1.250000e-01 : f32
    %29 = arith.mulf %28, %cst_12 : f32
    %c0_13 = arith.constant 0 : index
    %c0_14 = arith.constant 0 : index
    %30 = memref.load %arg1[%c0_13, %c0_14] : memref<1x1xf32, #tpu.memory_space<smem>>
    memref.store %29, %arg1[%c0_13, %c0_14] : memref<1x1xf32, #tpu.memory_space<smem>>
    return
  }
}

</mosaic_0001>

<bundles_post_ra>
// kernel: tpu_custom_call.1
= control target key start
LH: loop header
LB: loop body
LE: loop exit
PB: predicated region body
PF: predicated region fallthrough
CT: control target
= control target key end

     0   :  { %6 = vsyncpa [#allocation3], 0  ;;  %s145_s0 = inlined_call_operand.hbm [shape: f32[3,8,128], index: 0, kind: input, shape index: {}]   ;;  %s146_s1 = inlined_call_operand.hbm [shape: f32[1,1], index: 1, kind: output, shape index: {}]  }
   0x1   :  { %7 = vsyncpa [#allocation4], 0  ;;  %s125_s6 = smov [#allocation2]  }
   0x2   :  { %s13_s7 = sshll.u32 %s125_s6, 4  ;;  %s14_s7 = int_to_ptr.vmem [resolvable:$true] %s13_s7 }
   0x3   :  { %s101_s8 = scalar_lea.vmem %s14_s7, 384  ;;  %p106_p1 = scmp.lt.s32.totalorder %s14_s7, %s14_s7 }
   0x4   :  { %p102_p0 = scmp.ne.s32.totalorder %s14_s7, %s101_s8  ;;  %p107_p2 = scmp.lt.s32.totalorder %s101_s8, %s101_s8 }
   0x6   :  { %p108_p3 = por %p107_p2, %p106_p1 }
   0x8   :  { %p109_p4 = pnand %p108_p3, %p102_p0 }
   0xa   :  { %112 = shalt.err (!%p109_p4)
}
   0xb   :  { %s126_s9 = smov 128   ;;  %s127_s10 = smov 8  }
   0xc   :  { %19 = dma.hbm_to_vmem [thread:$0]  %s145_s0, 384, %s14_s7, [#allocation3], %s126_s9, %s126_s9, %s127_s10  }
   0xd   :  { %121 = dma.done.wait [#allocation3], 384  }
   0xe   :  { %122 = vsyncadd [#allocation3], 4294966912  ;;  %v23_v0 = vld [vmem:[#allocation2] sm:$0xff]  ;;  %v25_v1 = vld [vmem:[#allocation2 + $0x8] sm:$0xff]  ;;  %vm55_vm4 = vcmask 7168   ;;  %s128_s14 = smov [#allocation5]  }
   0xf   :  { %v27_v2 = vld [vmem:[#allocation2 + $0x10] sm:$0xff]  ;;  %v28_v3 = vsub.f32 %v23_v0, %v25_v1 }
  0x10   :  { %v30_v4 = vsub.f32 %v23_v0, %v27_v2 }
  0x11   :  { %v29_v5 = vadd.f32 1e-06, %v28_v3 }
  0x12   :  { %v31_v6 = vadd.f32 1e-06, %v30_v4 }
  0x13   :  { %v32_v7 = vmul.f32 %v29_v5, %v29_v5 }
  0x14   :  { %v42_v8 = vmul.f32 %v31_v6, %v31_v6 }
  0x15   :  { %33 = vadd.xlane.f32.xlu0 %v32_v7 }
  0x19   :  { %43 = vadd.xlane.f32.xlu0 %v42_v8 }
  0x9e   :  { %v34_v9 = vpop.xlane.xlu0 %33 }
  0x9f   :  { %89 = vrsqrt.f32 %v34_v9  ;;  %vm37_vm0 = vcmp.eq.f32.partialorder %v34_v9, inf  ;;  %v40_v16 = vand.u32 2147483648, %v34_v9  ;;  %vm39_vm2 = vcmp.eq.f32.partialorder %v34_v9, 0.0 }
  0xa2   :  { %v44_v10 = vpop.xlane.xlu0 %43 }
  0xa3   :  { %91 = vrsqrt.f32 %v44_v10  ;;  %vm47_vm1 = vcmp.eq.f32.partialorder %v44_v10, inf  ;;  %v50_v17 = vand.u32 2147483648, %v44_v10  ;;  %vm49_vm3 = vcmp.eq.f32.partialorder %v44_v10, 0.0 }
  0xac   :  { %v90_v11 = vpop.eup %89 }
  0xad   :  { %v36_v12 = vmul.f32 %v90_v11, %v34_v9 }
  0xaf   :  { %v38_v15 = vsel %vm37_vm0, %v34_v9, %v36_v12 }
  0xb0   :  { %v92_v13 = vpop.eup %91  ;;  %v41_v19 = vsel %vm39_vm2, %v40_v16, %v38_v15 }
  0xb1   :  { %v46_v14 = vmul.f32 %v92_v13, %v44_v10 }
  0xb3   :  { %v48_v18 = vsel %vm47_vm1, %v44_v10, %v46_v14 }
  0xb4   :  { %v51_v20 = vsel %vm49_vm3, %v50_v17, %v48_v18 }
  0xb5   :  { %v52_v21 = vsub.f32 %v41_v19, %v51_v20 }
  0xb7   :  { %v53_v22 = vadd.f32 0.5, %v52_v21 }
  0xb9   :  { %v54_v23 = vmax.f32 %v53_v22, 0.0 }
  0xbb   :  { %v56_v24 = vsel %vm55_vm4, %v54_v23, 0.0 }
  0xbc   :  { %57 = vadd.xlane.f32.xlu1 %v56_v24 }
 0x145   :  { %v58_v25 = vpop.xlane.xlu1 %57 }
 0x146   :  { %v59_v26 = vrot.slane %v58_v25, 4 }
 0x148   :  { %v60_v27 = vadd.f32 %v59_v26, %v58_v25 }
 0x14a   :  { %v61_v28 = vrot.slane %v60_v27, 2 }
 0x14c   :  { %v62_v29 = vadd.f32 %v61_v28, %v60_v27 }
 0x14e   :  { %v63_v30 = vrot.slane %v62_v29, 1 }
 0x150   :  { %v64_v31 = vadd.f32 %v63_v30, %v62_v29 }
 0x152   :  { %83 = vpush %v64_v31 }
 0x183   :  { %s84_s0 = spop %83 }
 0x184   :  { %s66_s13 = smul.f32 0.125, %s84_s0 }
 0x186   :  { %68 = sst [smem:[#allocation5]] %s66_s13 }
 0x187   :  { %76 = dma.smem_to_hbm %s128_s14, 16, %s146_s1, [#allocation4]  }
 0x188   :  { %123 = dma.done.wait [#allocation4], 16  }
 0x189   :  { %124 = vsyncadd [#allocation4], 4294967280 }
 0x18a   :  { %80 = sfence }
 0x18b   :  { %81 = vsyncpa [#allocation3], 1 }
 0x18c   :  { %82 = vsyncpa [#allocation4], 1 }

</bundles_post_ra>
